<compile_context>
chip_gen: v7x
topology: tpu7x:2x2x1
jax: 0.10.0
libtpu: 0.0.40
codegen_flags: <defaults>
</compile_context>

<pallas_src>
import jax
import jax.numpy as jnp
from jax.experimental import pallas as pl
from jax.experimental.pallas import tpu as pltpu

NEG_SLOPE = 0.01  # PyTorch F.leaky_relu default


def _leaky(y):
    return jnp.where(y >= 0, y, NEG_SLOPE * y)


def _round_up(a, b):
    return (a + b - 1) // b * b


# ---------------------------------------------------------------------------
# Pallas kernel: 1x1x1 conv + bias + leaky_relu on pre-pooled activations.
#   x_ref : (Cin, Mt)   -- pooled positions (n, d, ho, wo) flattened on lanes
#   w_ref : (Cout, Cin)
#   b_ref : (Cout, 1)
#   o_ref : (Cout, Mt)
# ---------------------------------------------------------------------------
def _conv1x1_kernel(x_ref, w_ref, b_ref, o_ref):
    cout, mt = o_ref.shape
    cin = x_ref.shape[0]

    x = x_ref[...].astype(jnp.float32)                 # (Cin, Mt) lane-dense
    w = w_ref[...].astype(jnp.float32)                 # (Cout, Cin)

    # Channels are tiny: skip the MXU, do Cin rank-1 VPU FMAs with the spatial
    # dim on lanes.  Bias is folded into the accumulator init (no extra pass).
    acc = jnp.broadcast_to(b_ref[...].astype(jnp.float32), (cout, mt))
    for ci in range(cin):                              # unrolled, Cin = 4
        acc = acc + w[:, ci:ci + 1] * x[ci:ci + 1, :]  # (Cout,1) * (1,Mt)

    o_ref[...] = _leaky(acc).astype(o_ref.dtype)


# ---------------------------------------------------------------------------
# Wrapper: MaxPool3d (1,2,2)/(1,2,2) -> Conv3d 1x1x1 + bias -> leaky_relu
# ---------------------------------------------------------------------------
def maxpooling3d_forward(x, w, b, *, tile_m=32768):
    """x: (N, Cin, D, H, W); w: (Cout, Cin, 1, 1, 1); b: (Cout,)."""
    N, C, D, H, W = x.shape
    Cout = w.shape[0]
    Ho, Wo = H // 2, W // 2            # PyTorch MaxPool3d floor behavior
    Mp = D * Ho * Wo                   # pooled positions per batch element

    # --- Pre-pool in one fused XLA elementwise pass (no 4x-expanded tap
    # array, no transpose): max over the H stride-2 slices, then W stride-2.
    xc = x[:, :, :, :2 * Ho, :2 * Wo]
    pooled = jnp.maximum(xc[:, :, :, 0::2, :], xc[:, :, :, 1::2, :])
    pooled = jnp.maximum(pooled[..., 0::2], pooled[..., 1::2])     # (N,C,D,Ho,Wo)
    xr = pooled.reshape(N, C, Mp)                                  # free reshape

    # --- Lane-aligned tiling of the pooled-position axis (validated).
    tile_m = max(128, (int(tile_m) // 128) * 128)      # force multiple of 128
    Mt = min(_round_up(Mp, 128), tile_m)
    # v7x megacore: keep >= 2 total grid steps when possible (N may be 1).
    if N == 1 and Mt >= 256 and _round_up(Mp, Mt) == Mt:
        Mt = _round_up((Mt + 1) // 2, 128)
    M_pad = _round_up(Mp, Mt)
    if M_pad != Mp:
        # Padded tail computes leaky(bias) on zeros and is sliced off below.
        xr = jnp.pad(xr, ((0, 0), (0, 0), (0, M_pad - Mp)))

    wk = w.reshape(Cout, C)                            # (Cout, Cin)
    bb = b.reshape(Cout, 1)

    out = pl.pallas_call(
        _conv1x1_kernel,
        out_shape=jax.ShapeDtypeStruct((N, Cout, M_pad), x.dtype),
        grid_spec=pltpu.PrefetchScalarGridSpec(
            num_scalar_prefetch=0,
            grid=(N, M_pad // Mt),
            in_specs=[
                pl.BlockSpec((None, C, Mt), lambda n, i: (n, 0, i)),
                pl.BlockSpec((Cout, C), lambda n, i: (0, 0)),   # fetched once
                pl.BlockSpec((Cout, 1), lambda n, i: (0, 0)),   # fetched once
            ],
            out_specs=pl.BlockSpec((None, Cout, Mt), lambda n, i: (n, 0, i)),
        ),
        compiler_params=pltpu.CompilerParams(
            dimension_semantics=("parallel", "parallel")),
    )(xr, wk, bb)

    # Exit is a pure reshape (no transpose): (N, Cout, M') -> NCDHW.
    return out[:, :, :Mp].reshape(N, Cout, D, Ho, Wo)


# ---------------------------------------------------------------------------
# Pure-JAX reference (for correctness check)
# ---------------------------------------------------------------------------
def maxpooling3d_ref(x, w, b):
    N, C, D, H, W = x.shape
    Ho, Wo = H // 2, W // 2
    xp = x[:, :, :, :2 * Ho, :2 * Wo].reshape(N, C, D, Ho, 2, Wo, 2)
    pooled = xp.max(axis=(4, 6))
    y = jnp.einsum("oc,ncdhw->nodhw", w[:, :, 0, 0, 0], pooled)
    return _leaky(y + b.reshape(1, -1, 1, 1, 1))


if __name__ == "__main__":
    # Small shapes consistent with the module (NCDHW input).
    N, C, D, H, W = 2, 4, 7, 16, 16
    COUT = 8   # bottleneck outplanes

    key = jax.random.PRNGKey(0)
    kx, kw, kb = jax.random.split(key, 3)
    x = jax.random.normal(kx, (N, C, D, H, W), jnp.float32)
    w = jax.random.normal(kw, (COUT, C, 1, 1, 1), jnp.float32) / jnp.sqrt(C)
    b = 0.05 * jax.random.normal(kb, (COUT,), jnp.float32)

    fwd = jax.jit(maxpooling3d_forward, static_argnames=("tile_m",))
    ref = jax.block_until_ready(maxpooling3d_ref(x, w, b))

    # Small tile to exercise the multi-tile + M-padding path (Mp=448 -> 512).
    out_small = jax.block_until_ready(fwd(x, w, b, tile_m=256))
    # Default (large) tile: single tile per batch element, grid=(N, 1).
    out_default = jax.block_until_ready(fwd(x, w, b))

    for out in (out_small, out_default):
        assert out.shape == (N, COUT, D, H // 2, W // 2), out.shape
        max_err = float(jnp.max(jnp.abs(out - ref)))
        assert max_err < 1e-4, f"mismatch vs reference: {max_err}"

    print("KERNEL_OK")
</pallas_src>

<mosaic_0001>
module attributes {stable_mosaic.version = 11 : i64} {
  func.func @_conv1x1_kernel(%arg0: i32, %arg1: i32, %arg2: memref<1x4x256xf32, #tpu.memory_space<vmem>>, %arg3: memref<8x4xf32, #tpu.memory_space<vmem>>, %arg4: memref<8x1xf32, #tpu.memory_space<vmem>>, %arg5: memref<1x8x256xf32, #tpu.memory_space<vmem>>) attributes {dimension_semantics = [#tpu.dimension_semantics<parallel>, #tpu.dimension_semantics<parallel>], iteration_bounds = array<i64: 2, 2>, scalar_prefetch = 0 : i64, scratch_operands = 0 : i64, tpu.core_type = #tpu.core_type<tc>, window_params = [{transform_indices = @transform_0, window_bounds = array<i64: 1, 4, 256>}, {pipeline_mode = #tpu.pipeline_mode<synchronous>, transform_indices = @transform_1, window_bounds = array<i64: 8, 4>}, {pipeline_mode = #tpu.pipeline_mode<synchronous>, transform_indices = @transform_2, window_bounds = array<i64: 8, 1>}, {transform_indices = @transform_3, window_bounds = array<i64: 1, 8, 256>}]} {
    %c0 = arith.constant 0 : index
    %c0_0 = arith.constant 0 : index
    %c0_1 = arith.constant 0 : index
    %0 = vector.load %arg2[%c0, %c0_0, %c0_1] : memref<1x4x256xf32, #tpu.memory_space<vmem>>, vector<1x4x256xf32>
    %1 = vector.shape_cast %0 : vector<1x4x256xf32> to vector<4x256xf32>
    %c0_2 = arith.constant 0 : index
    %c0_3 = arith.constant 0 : index
    %2 = vector.load %arg3[%c0_2, %c0_3] : memref<8x4xf32, #tpu.memory_space<vmem>>, vector<8x4xf32>
    %c0_4 = arith.constant 0 : index
    %c0_5 = arith.constant 0 : index
    %3 = vector.load %arg4[%c0_4, %c0_5] : memref<8x1xf32, #tpu.memory_space<vmem>>, vector<8x1xf32>
    %4 = vector.shape_cast %3 : vector<8x1xf32> to vector<8x1xf32>
    %5 = vector.broadcast %4 : vector<8x1xf32> to vector<8x256xf32>
    %6 = vector.extract_strided_slice %2 {offsets = [0, 0], sizes = [8, 1], strides = [1, 1]} : vector<8x4xf32> to vector<8x1xf32>
    %7 = vector.extract_strided_slice %1 {offsets = [0, 0], sizes = [1, 256], strides = [1, 1]} : vector<4x256xf32> to vector<1x256xf32>
    %8 = vector.broadcast %6 : vector<8x1xf32> to vector<8x256xf32>
    %9 = vector.broadcast %7 : vector<1x256xf32> to vector<8x256xf32>
    %10 = arith.mulf %8, %9 : vector<8x256xf32>
    %11 = arith.addf %5, %10 : vector<8x256xf32>
    %12 = vector.extract_strided_slice %2 {offsets = [0, 1], sizes = [8, 1], strides = [1, 1]} : vector<8x4xf32> to vector<8x1xf32>
    %13 = vector.extract_strided_slice %1 {offsets = [1, 0], sizes = [1, 256], strides = [1, 1]} : vector<4x256xf32> to vector<1x256xf32>
    %14 = vector.broadcast %12 : vector<8x1xf32> to vector<8x256xf32>
    %15 = vector.broadcast %13 : vector<1x256xf32> to vector<8x256xf32>
    %16 = arith.mulf %14, %15 : vector<8x256xf32>
    %17 = arith.addf %11, %16 : vector<8x256xf32>
    %18 = vector.extract_strided_slice %2 {offsets = [0, 2], sizes = [8, 1], strides = [1, 1]} : vector<8x4xf32> to vector<8x1xf32>
    %19 = vector.extract_strided_slice %1 {offsets = [2, 0], sizes = [1, 256], strides = [1, 1]} : vector<4x256xf32> to vector<1x256xf32>
    %20 = vector.broadcast %18 : vector<8x1xf32> to vector<8x256xf32>
    %21 = vector.broadcast %19 : vector<1x256xf32> to vector<8x256xf32>
    %22 = arith.mulf %20, %21 : vector<8x256xf32>
    %23 = arith.addf %17, %22 : vector<8x256xf32>
    %24 = vector.extract_strided_slice %2 {offsets = [0, 3], sizes = [8, 1], strides = [1, 1]} : vector<8x4xf32> to vector<8x1xf32>
    %25 = vector.extract_strided_slice %1 {offsets = [3, 0], sizes = [1, 256], strides = [1, 1]} : vector<4x256xf32> to vector<1x256xf32>
    %26 = vector.broadcast %24 : vector<8x1xf32> to vector<8x256xf32>
    %27 = vector.broadcast %25 : vector<1x256xf32> to vector<8x256xf32>
    %28 = arith.mulf %26, %27 : vector<8x256xf32>
    %29 = arith.addf %23, %28 : vector<8x256xf32>
    %cst = arith.constant 0.000000e+00 : f32
    %30 = vector.broadcast %cst : f32 to vector<8x256xf32>
    %31 = arith.cmpf oge, %29, %30 : vector<8x256xf32>
    %cst_6 = arith.constant 0.00999999977 : f32
    %32 = vector.broadcast %cst_6 : f32 to vector<8x256xf32>
    %33 = arith.mulf %32, %29 : vector<8x256xf32>
    %34 = arith.select %31, %29, %33 : vector<8x256xi1>, vector<8x256xf32>
    %c0_7 = arith.constant 0 : index
    %c0_8 = arith.constant 0 : index
    %c0_9 = arith.constant 0 : index
    %35 = vector.load %arg5[%c0_7, %c0_8, %c0_9] : memref<1x8x256xf32, #tpu.memory_space<vmem>>, vector<1x8x256xf32>
    %36 = vector.shape_cast %35 : vector<1x8x256xf32> to vector<8x256xf32>
    %37 = vector.shape_cast %34 : vector<8x256xf32> to vector<1x8x256xf32>
    tpu.vector_store %arg5[%c0_7, %c0_8, %c0_9], %37 {strides = array<i32>} : memref<1x8x256xf32, #tpu.memory_space<vmem>>, vector<1x8x256xf32>,
    return
  }
  func.func @transform_0(%arg0: i32, %arg1: i32) -> (i32, i32, i32) {
    %c0_i32 = arith.constant 0 : i32
    %c0_i32_0 = arith.constant 0 : i32
    return %arg0, %c0_i32, %arg1 : i32, i32, i32
  }
  func.func @transform_1(%arg0: i32, %arg1: i32) -> (i32, i32) {
    %c0_i32 = arith.constant 0 : i32
    %c0_i32_0 = arith.constant 0 : i32
    %c0_i32_1 = arith.constant 0 : i32
    return %c0_i32, %c0_i32_0 : i32, i32
  }
  func.func @transform_2(%arg0: i32, %arg1: i32) -> (i32, i32) {
    %c0_i32 = arith.constant 0 : i32
    %c0_i32_0 = arith.constant 0 : i32
    %c0_i32_1 = arith.constant 0 : i32
    return %c0_i32, %c0_i32_0 : i32, i32
  }
  func.func @transform_3(%arg0: i32, %arg1: i32) -> (i32, i32, i32) {
    %c0_i32 = arith.constant 0 : i32
    %c0_i32_0 = arith.constant 0 : i32
    return %arg0, %c0_i32, %arg1 : i32, i32, i32
  }
}

</mosaic_0001>

<bundles_post_ra>
// kernel: maxpooling3d_forward.1
= control target key start
LH: loop header
LB: loop body
LE: loop exit
PB: predicated region body
PF: predicated region fallthrough
CT: control target
= control target key end

     0   :  { %s547_s12 = smov 0   ;;  %s549_s13 = smov 0   ;;  %s615_s0 = inlined_call_operand.vmem [shape: f32[2,4,512], index: 0, kind: input, shape index: {}]   ;;  %s616_s1 = inlined_call_operand.vmem [shape: f32[8,4], index: 1, kind: input, shape index: {}]   ;;  %s617_s2 = inlined_call_operand.vmem [shape: f32[8,1], index: 2, kind: input, shape index: {}]   ;;  %s618_s3 = inlined_call_operand.vmem [shape: f32[2,8,512], index: 3, kind: output, shape index: {}]  }
   0x1   :  { %s551_s14 = smov 0   ;;  %s553_s15 = smov 0  }
   0x2   :  { %s555_s16 = smov 0  }
   0x3 LB: > { %s22_s17 = sadd.s32 1, %s513_s14  ;;  %s25_s18 = sadd.s32 1, %s517_s15  ;;  %s521_s16 = sphi %s555_s16, %s13_s16   ;;  %s517_s15 = sphi %s553_s15, %s622_s15   ;;  %s513_s14 = sphi %s551_s14, %s621_s14   ;;  %s509_s13 = sphi %s549_s13, %s620_s13   ;;  %s505_s12 = sphi %s547_s12, %s619_s12  }
   0x4   : > { %p23_p0 = scmp.ge.s32.totalorder %s22_s17, 2  ;;  %p426_p1 = scmp.ge.s32.totalorder %s521_s16, 1 }
   0x5   : > { %p158_p2 = scmp.lt.s32.totalorder %s521_s16, 5 }
   0x6   : > { %s624_s17 = smov (%p23_p0, %s22_s17), 0  ;;  %s626_s18 = smov (!%p23_p0, %s25_s18), %s517_s15 }
   0x7   : > { %p159_p3 = pnand %p426_p1, %p158_p2  ;;  %p27_p4 = scmp.ge.s32.totalorder %s626_s18, 2 }
   0x8   : > { %v211_v0 = vld [vmem:[%s616_s1] sm:$0xff] (!%p159_p3)  ;;  %v523_v1 = vmov (!%p159_p3), 0   ;;  %v524_v2 = vmov (!%p159_p3), 1   ;;  %v525_v4 = vmov (!%p159_p3), 2   ;;  %v526_v5 = vmov (!%p159_p3), 3   ;;  %s427_s23 = sshll.u32 (!%p159_p3), %s505_s12, 1 }
   0x9   : > { %s628_s18 = smov (%p27_p4, %s626_s18), 0  ;;  %162 = sbr.rel (%p159_p3) target bundleno = 156 (0x9c), region = 32 }
   0xa   : > { %479 = vset.pattern.permute.xlu0 (!%p159_p3), %v523_v1  ;;  %480 = vset.pattern.permute.xlu1 (!%p159_p3), %v524_v2  ;;  %v212_v3 = vld [vmem:[%s617_s2] sm:$0xff] (!%p159_p3)  ;;  %p191_p5 = scmp.lt.s32.totalorder (!%p159_p3), %s509_s13, 1  ;;  %p193_p6 = scmp.lt.s32.totalorder (!%p159_p3), %s427_s23, 3  ;;  %v224_v6 = vlaneseq (!%p159_p3) }
   0xb   : > { %220 = vperm.xlu0 (!%p159_p3), %479, %v211_v0   ;;  %247 = vperm.xlu1 (!%p159_p3), %480, %v211_v0  }
   0xc   : > { %v225_v7 = vshrl.u32 (!%p159_p3), %v224_v6, 7 }
   0xe   : > { %v226_v8 = vsub.s32 (!%p159_p3), 0, %v225_v7  ;;  %v230_v9 = vsub.s32 (!%p159_p3), 4, %v225_v7  ;;  %v252_v11 = vsub.s32 (!%p159_p3), 1, %v225_v7  ;;  %v256_v12 = vsub.s32 (!%p159_p3), 5, %v225_v7 }
   0xf   : > { %215 = vperm.xlu0 (!%p159_p3), %479, %v212_v3   ;;  %481 = vset.pattern.permute.xlu1 (!%p159_p3), %v525_v4  ;;  %v278_v13 = vsub.s32 (!%p159_p3), 2, %v225_v7  ;;  %v282_v14 = vsub.s32 (!%p159_p3), 6, %v225_v7  ;;  %v304_v21 = vsub.s32 (!%p159_p3), 3, %v225_v7  ;;  %v308_v22 = vsub.s32 (!%p159_p3), 7, %v225_v7 }
  0x10   : > { %273 = vperm.xlu1 %481, %v211_v0   ;;  %s630_s13 = smov (!%p191_p5, %s509_s13), 1  ;;  %s632_s23 = smov (!%p193_p6, %s427_s23), 3 }
  0x11   : > { %s428_s24 = sshll.u32 %s630_s13, 2 }
  0x12   : > { %s590_s25 = sadd.s32 %s428_s24, %s632_s23 }
  0x13   : > { %482 = vset.pattern.permute.xlu0 %v526_v5  ;;  %s429_s26 = sshll.u32 %s590_s25, 2  ;;  %s432_s30 = sshll.u32 %s590_s25, 3 }
  0x14   : > { %299 = vperm.xlu0 %482, %v211_v0   ;;  %s198_s29 = scalar_lea.vmem %s615_s0, %s429_s26  ;;  %s208_s6 = scalar_lea.vmem %s618_s3, %s432_s30 }
  0x15   : > { %v210_v10 = vld [vmem:[%s198_s29] sm:$0xff] }
  0x16   : > { %v227_v15 = vrot.slane %v210_v10, %v226_v8  ;;  %v231_v16 = vrot.slane %v210_v10, %v230_v9  ;;  %v253_v17 = vrot.slane %v210_v10, %v252_v11  ;;  %v257_v18 = vrot.slane %v210_v10, %v256_v12 }
  0x17   : > { %v279_v19 = vrot.slane %v210_v10, %v278_v13  ;;  %v283_v20 = vrot.slane %v210_v10, %v282_v14  ;;  %v305_v31 = vrot.slane %v210_v10, %v304_v21  ;;  %v309_v32 = vrot.slane %v210_v10, %v308_v22 }
  0x18   : > { %v237_v23 = vrot.slane %v227_v15, %v226_v8  ;;  %v241_v24 = vrot.slane %v231_v16, %v226_v8  ;;  %v263_v27 = vrot.slane %v253_v17, %v252_v11  ;;  %v267_v28 = vrot.slane %v257_v18, %v252_v11 }
  0x19   : > { %v289_v29 = vrot.slane %v279_v19, %v278_v13  ;;  %v293_v30 = vrot.slane %v283_v20, %v278_v13  ;;  %v315_v43 = vrot.slane %v305_v31, %v304_v21  ;;  %v319_v44 = vrot.slane %v309_v32, %v304_v21 }
  0x8a   : > { %v221_v25 = vpop.permute.xlu0 %220  ;;  %v248_v26 = vpop.permute.xlu1 %247 }
  0x8b   : > { %v242_v33 = vmul.f32 %v237_v23, %v221_v25  ;;  %v243_v34 = vmul.f32 %v241_v24, %v221_v25  ;;  %v268_v36 = vmul.f32 %v263_v27, %v248_v26  ;;  %v269_v37 = vmul.f32 %v267_v28, %v248_v26 }
  0x8e   : > { %v216_v35 = vpop.permute.xlu0 %215 }
  0x8f   : > { %v244_v38 = vadd.f32 %v242_v33, %v216_v35  ;;  %v245_v39 = vadd.f32 %v243_v34, %v216_v35  ;;  %v274_v40 = vpop.permute.xlu1 %273 }
  0x90   : > { %v294_v41 = vmul.f32 %v289_v29, %v274_v40  ;;  %v295_v42 = vmul.f32 %v293_v30, %v274_v40 }
  0x91   : > { %v270_v45 = vadd.f32 %v268_v36, %v244_v38  ;;  %v271_v46 = vadd.f32 %v269_v37, %v245_v39 }
  0x93   : > { %v296_v47 = vadd.f32 %v294_v41, %v270_v45  ;;  %v297_v48 = vadd.f32 %v295_v42, %v271_v46  ;;  %v300_v49 = vpop.permute.xlu0 %299 }
  0x94   : > { %v320_v50 = vmul.f32 %v315_v43, %v300_v49  ;;  %v321_v51 = vmul.f32 %v319_v44, %v300_v49 }
  0x96   : > { %v322_v52 = vadd.f32 %v320_v50, %v296_v47  ;;  %v323_v53 = vadd.f32 %v321_v51, %v297_v48 }
  0x98   : > { %vm324_vm0 = vcmp.ge.f32.partialorder %v322_v52, 0.0  ;;  %vm325_vm1 = vcmp.ge.f32.partialorder %v323_v53, 0.0  ;;  %v326_v54 = vmul.f32 0.01, %v322_v52  ;;  %v327_v55 = vmul.f32 0.01, %v323_v53 }
  0x9a   : > { %v328_v56 = vsel %vm324_vm0, %v322_v52, %v326_v54  ;;  %v329_v57 = vsel %vm325_vm1, %v323_v53, %v327_v55 }
  0x9b   : > { %330 = vst [vmem:[%s208_s6] sm:$0xff] %v328_v56  ;;  %331 = vst [vmem:[%s208_s6 + $0x8] sm:$0xff] %v329_v57 }
  0x9c PF: > { %s13_s16 = sadd.s32 1, %s521_s16   ;;  %s619_s12 = smov %s513_s14 }
  0x9d   : > { %p10_p7 = scmp.ge.s32.totalorder %s13_s16, 6   ;;  %s620_s13 = smov %s517_s15 }
  0x9e   : > { %s621_s14 = smov %s624_s17  ;;  %s622_s15 = smov %s628_s18 }
  0x9f   :  { %12 = sbr.rel (!%p10_p7) target bundleno = 3 (0x3), region = 62 }

</bundles_post_ra>
